<compile_context>
chip_gen: v6e
topology: v6e:2x2x1
jax: 0.10.0
libtpu: 0.0.40
codegen_flags: <defaults>
</compile_context>

<pallas_src>
import functools

import jax
import jax.numpy as jnp
import numpy as np
from jax.experimental import pallas as pl
from jax.experimental.pallas import tpu as pltpu

NUM_FREQUENCIES = 10   # matches PositionalEncoding(num_frequencies=10)
_LANES = 128


def _round_up(a: int, b: int) -> int:
    return -(-a // b) * b


def _choose_pack(n_pos: int, d: int, out_width: int) -> int:
    """Number of positions packed per output row (maximizes lane density)."""
    best_score, best_p = (False, -1.0, 0), 1
    for p in (1, 2, 4, 8, 16, 32):
        if n_pos % p or p * d > _LANES or p * out_width > 2048:
            continue
        row_w = p * out_width
        util = row_w / float(_round_up(row_w, _LANES))
        # prefer: full sublane use, dense lanes, then the smallest pack factor
        score = (n_pos // p >= 8, util, -p)
        if score > best_score:
            best_score, best_p = score, p
    return best_p


def _build_constants(d: int, num_frequencies: int, pack: int):
    """Selection matrix (K, L) and sin-lane mask (1, L) for the packed row layout.

    Column k of `sel` has exactly one nonzero, 2^i (exact power of two), at the row
    of the input element it reads, so the MXU matmul is an exact gather + scale.
    """
    out_width = 2 * num_frequencies * d
    k_dim, l_dim = pack * d, pack * out_width
    sel = np.zeros((k_dim, l_dim), np.float32)
    sin_mask = np.zeros((1, l_dim), np.float32)
    for k in range(l_dim):
        p, kk = divmod(k, out_width)        # position-in-pack, feature index
        i, r = divmod(kk, 2 * d)            # frequency, index within [sin d.., cos d..]
        sel[p * d + (r % d), k] = np.float32(2.0 ** i)
        if r < d:
            sin_mask[0, k] = 1.0
    return jnp.asarray(sel), jnp.asarray(sin_mask)


def _pos_enc_kernel(x_ref, sel_ref, mask_ref, o_ref, arg_ref, *, strip: int):
    """x_ref: (tile, K) packed inputs; o_ref: (tile, L) final interleaved encoding."""
    l_dim = o_ref.shape[1]
    # Exact per-lane gather of x + 2^i frequency scaling on the MXU
    # (one nonzero power-of-two per column => bit-exact at HIGHEST precision).
    arg_ref[...] = jnp.dot(x_ref[...], sel_ref[...],
                           precision=jax.lax.Precision.HIGHEST,
                           preferred_element_type=jnp.float32)
    is_sin = jnp.broadcast_to(mask_ref[...] > 0.0, (strip, l_dim))  # hoisted once

    # Strip-mine the trig so sin/cos temporaries stay register-resident.
    @pl.loop(0, o_ref.shape[0] // strip)
    def _(s):
        r0 = pl.multiple_of(s * strip, strip)
        a = arg_ref[pl.ds(r0, strip), :]
        enc = jnp.where(is_sin, jnp.sin(a), jnp.cos(a))
        o_ref[pl.ds(r0, strip), :] = enc.astype(o_ref.dtype)


def positional_encoding(x: jax.Array,
                        num_frequencies: int = NUM_FREQUENCIES,
                        out_dtype=jnp.float32) -> jax.Array:
    """Pallas positional encoding; x: (..., D) -> (..., 2*num_frequencies*D)."""
    x = x.astype(jnp.float32)
    *lead, d = x.shape
    n_pos = x.size // d
    out_width = 2 * num_frequencies * d

    pack = _choose_pack(n_pos, d, out_width)
    k_dim, l_dim = pack * d, pack * out_width
    rows = n_pos // pack

    sel, sin_mask = _build_constants(d, num_frequencies, pack)
    x2 = x.reshape(rows, k_dim)      # contiguous reshape; no separate pad pass

    # Row tiling: big blocks amortize the ~0.35us/step overhead, >=2 blocks keeps
    # both v7x TensorCores busy, and the footprint stays well under the scoped-VMEM
    # defaults (v5e 16 MiB / v6e 32 MiB / v7x 32 MiB): ~3 * tile*L*4 B ~ 6 MiB max.
    target_rows = max(32, ((1 << 19) // max(l_dim, 1)) // 32 * 32)   # ~2 MiB out block
    num_tiles = max(1, -(-rows // target_rows))
    if rows >= 64:
        num_tiles = max(num_tiles, 2)
    tile_rows = min(_round_up(-(-rows // num_tiles), 8), _round_up(rows, 8))
    strip = next(s for s in (32, 16, 8) if tile_rows % s == 0)
    grid = -(-rows // tile_rows)

    cost = pl.CostEstimate(
        flops=2 * rows * k_dim * l_dim + 2 * rows * l_dim,
        transcendentals=2 * rows * l_dim,
        bytes_accessed=rows * (k_dim * 4 + l_dim * jnp.dtype(out_dtype).itemsize),
    )

    out2 = pl.pallas_call(
        functools.partial(_pos_enc_kernel, strip=strip),
        out_shape=jax.ShapeDtypeStruct((rows, l_dim), out_dtype),
        grid=(grid,),
        in_specs=[
            pl.BlockSpec((tile_rows, k_dim), lambda i: (i, 0)),
            pl.BlockSpec((k_dim, l_dim), lambda i: (0, 0)),   # constants: same block
            pl.BlockSpec((1, l_dim), lambda i: (0, 0)),       # every step (no re-DMA)
        ],
        out_specs=pl.BlockSpec((tile_rows, l_dim), lambda i: (i, 0)),
        scratch_shapes=[pltpu.VMEM((tile_rows, l_dim), jnp.float32)],
        compiler_params=pltpu.CompilerParams(dimension_semantics=("parallel",)),
        cost_estimate=cost,
    )(x2, sel, sin_mask)

    # (rows, pack*out_width) already has the final element order: reshape is free.
    return out2.reshape(*lead, out_width)


def _reference(x, num_frequencies=NUM_FREQUENCIES):
    outs = []
    for i in range(num_frequencies):
        outs.append(jnp.sin((2.0 ** i) * x))
        outs.append(jnp.cos((2.0 ** i) * x))
    return jnp.concatenate(outs, axis=-1)


if __name__ == "__main__":
    key = jax.random.PRNGKey(0)
    # Small NeRF-like input: (batch, rays, samples, 3-D coordinates).
    x = jax.random.normal(key, (2, 4, 16, 3), dtype=jnp.float32)

    out = positional_encoding(x)
    out = jax.block_until_ready(out)

    ref = _reference(x)
    assert out.shape == (2, 4, 16, 2 * NUM_FREQUENCIES * 3), out.shape
    assert out.dtype == jnp.float32, out.dtype
    err = float(jnp.max(jnp.abs(out - ref)))
    assert jnp.allclose(out, ref, atol=5e-5, rtol=1e-5), f"max abs err {err}"

    print("KERNEL_OK")
</pallas_src>

<mosaic_0001>
module attributes {stable_mosaic.version = 11 : i64} {
  func.func @_pos_enc_kernel(%arg0: i32, %arg1: memref<32x6xf32, #tpu.memory_space<vmem>>, %arg2: memref<6x120xf32, #tpu.memory_space<vmem>>, %arg3: memref<1x120xf32, #tpu.memory_space<vmem>>, %arg4: memref<32x120xf32, #tpu.memory_space<vmem>>, %arg5: memref<32x120xf32, #tpu.memory_space<vmem>>) attributes {dimension_semantics = [#tpu.dimension_semantics<parallel>], iteration_bounds = array<i64: 2>, scalar_prefetch = 0 : i64, scratch_operands = 1 : i64, tpu.core_type = #tpu.core_type<tc>, window_params = [{transform_indices = @transform_0, window_bounds = array<i64: 32, 6>}, {pipeline_mode = #tpu.pipeline_mode<synchronous>, transform_indices = @transform_1, window_bounds = array<i64: 6, 120>}, {pipeline_mode = #tpu.pipeline_mode<synchronous>, transform_indices = @transform_2, window_bounds = array<i64: 1, 120>}, {transform_indices = @transform_3, window_bounds = array<i64: 32, 120>}]} {
    %c0 = arith.constant 0 : index
    %c0_0 = arith.constant 0 : index
    %0 = vector.load %arg1[%c0, %c0_0] : memref<32x6xf32, #tpu.memory_space<vmem>>, vector<32x6xf32>
    %c0_1 = arith.constant 0 : index
    %c0_2 = arith.constant 0 : index
    %1 = vector.load %arg2[%c0_1, %c0_2] : memref<6x120xf32, #tpu.memory_space<vmem>>, vector<6x120xf32>
    %cst = arith.constant dense<0.000000e+00> : vector<32x120xf32>
    %2 = tpu.matmul %0, %1, %cst {dimension_numbers = #tpu.dot_dimension_numbers<[1], [0], [0], [1], [0, 0, 1, 1], [], []>, precision = #tpu.contract_precision<fp32>} : vector<32x6xf32>, vector<6x120xf32>, vector<32x120xf32> -> vector<32x120xf32>
    %c0_3 = arith.constant 0 : index
    %c0_4 = arith.constant 0 : index
    %3 = vector.load %arg5[%c0_3, %c0_4] : memref<32x120xf32, #tpu.memory_space<vmem>>, vector<32x120xf32>
    tpu.vector_store %arg5[%c0_3, %c0_4], %2 {strides = array<i32>} : memref<32x120xf32, #tpu.memory_space<vmem>>, vector<32x120xf32>,
    %c0_5 = arith.constant 0 : index
    %c0_6 = arith.constant 0 : index
    %4 = vector.load %arg3[%c0_5, %c0_6] : memref<1x120xf32, #tpu.memory_space<vmem>>, vector<1x120xf32>
    %cst_7 = arith.constant 0.000000e+00 : f32
    %5 = vector.broadcast %cst_7 : f32 to vector<1x120xf32>
    %6 = arith.cmpf ogt, %4, %5 : vector<1x120xf32>
    %7 = vector.shape_cast %6 : vector<1x120xi1> to vector<1x120xi1>
    %8 = vector.broadcast %7 : vector<1x120xi1> to vector<32x120xi1>
    %c0_i32 = arith.constant 0 : i32
    %c1_i32 = arith.constant 1 : i32
    %9 = arith.muli %c0_i32, %c1_i32 : i32
    %c0_i32_8 = arith.constant 0 : i32
    %10 = arith.addi %c0_i32_8, %9 : i32
    %c32_i32 = arith.constant 32 : i32
    %11 = arith.muli %10, %c32_i32 : i32
    %12 = tpu.assume_multiple %11, 32 : i32
    %13 = arith.index_cast %12 : i32 to index
    %c0_9 = arith.constant 0 : index
    %14 = vector.load %arg5[%13, %c0_9] : memref<32x120xf32, #tpu.memory_space<vmem>>, vector<32x120xf32>
    %15 = math.sin %14 : vector<32x120xf32>
    %16 = math.cos %14 : vector<32x120xf32>
    %17 = arith.select %8, %15, %16 : vector<32x120xi1>, vector<32x120xf32>
    %18 = arith.index_cast %12 : i32 to index
    %c0_10 = arith.constant 0 : index
    %19 = vector.load %arg4[%18, %c0_10] : memref<32x120xf32, #tpu.memory_space<vmem>>, vector<32x120xf32>
    tpu.vector_store %arg4[%18, %c0_10], %17 {strides = array<i32>} : memref<32x120xf32, #tpu.memory_space<vmem>>, vector<32x120xf32>,
    %c1_i32_11 = arith.constant 1 : i32
    return
  }
  func.func @transform_0(%arg0: i32) -> (i32, i32) {
    %c0_i32 = arith.constant 0 : i32
    %c0_i32_0 = arith.constant 0 : i32
    return %arg0, %c0_i32 : i32, i32
  }
  func.func @transform_1(%arg0: i32) -> (i32, i32) {
    %c0_i32 = arith.constant 0 : i32
    %c0_i32_0 = arith.constant 0 : i32
    %c0_i32_1 = arith.constant 0 : i32
    return %c0_i32, %c0_i32_0 : i32, i32
  }
  func.func @transform_2(%arg0: i32) -> (i32, i32) {
    %c0_i32 = arith.constant 0 : i32
    %c0_i32_0 = arith.constant 0 : i32
    %c0_i32_1 = arith.constant 0 : i32
    return %c0_i32, %c0_i32_0 : i32, i32
  }
  func.func @transform_3(%arg0: i32) -> (i32, i32) {
    %c0_i32 = arith.constant 0 : i32
    %c0_i32_0 = arith.constant 0 : i32
    return %arg0, %c0_i32 : i32, i32
  }
}

</mosaic_0001>

<bundles_post_ra>
// kernel: tpu_custom_call.1
= control target key start
LH: loop header
LB: loop body
LE: loop exit
PB: predicated region body
PF: predicated region fallthrough
CT: control target
= control target key end

     0   :  { %8 = vsyncpa [#allocation4], 0  ;;  %s2428_s0 = inlined_call_operand.vmem [shape: f32[64,6], index: 0, kind: input, shape index: {}]   ;;  %s2429_s1 = inlined_call_operand.vmem [shape: f32[6,120], index: 1, kind: input, shape index: {}]   ;;  %s2430_s2 = inlined_call_operand.vmem [shape: f32[1,120], index: 2, kind: input, shape index: {}]   ;;  %s2431_s3 = inlined_call_operand.hbm [shape: f32[64,120], index: 3, kind: output, shape index: {}]  }
   0x1   :  { %10 = vsyncpa [#allocation4 + $0x1], 0  ;;  %s1993_s12 = smov 0   ;;  %s1995_s13 = smov 0  }
   0x2   :  { %s1997_s14 = smov 0   ;;  %s1999_s15 = smov 0  }
   0x3 LB: > { %s2014_s16 = sadd.s32 4294967295, %s1961_s15   ;;  %s1698_s17 = sadd.s32 4294967294, %s1961_s15   ;;  %s1961_s15 = sphi %s1999_s15, %s2441_s15   ;;  %s1957_s14 = sphi %s1997_s14, %s2440_s14   ;;  %s1953_s13 = sphi %s1995_s13, %s2439_s13   ;;  %s1949_s12 = sphi %s1993_s12, %s2438_s12  }
   0x4   : > { %s2018_s18 = sadd.s32 1, %s1961_s15   ;;  %s91_s19 = sadd.s32 1, %s1957_s14 }
   0x5   : > { %s88_s20 = ssub.s32 %s1961_s15, %s2018_s18  ;;  %p101_p0 = scmp.ne.s32.totalorder %s1957_s14, %s1953_s13 }
   0x6   : > { %p89_p1 = scmp.eq.s32.totalorder %s88_s20, 0  ;;  %p102_p2 = scmp.eq.s32.totalorder %s2014_s16, 1 }
   0x7   : > { %p107_p3 = scmp.ne.s32.totalorder %s1953_s13, %s1949_s12  ;;  %p108_p4 = scmp.eq.s32.totalorder %s1698_s17, 1 }
   0x8   : > { %s2029_s21 = scalar_select %p89_p1, %s1957_s14, %s91_s19  }
   0x9   : > { %p2031_p5 = por %p102_p2, %p101_p0  ;;  %p2035_p6 = por %p108_p4, %p107_p3 }
   0xa   : > { %p1701_p7 = scmp.ge.s32.totalorder %s1961_s15, 1  ;;  %p141_p8 = scmp.lt.s32.totalorder %s1961_s15, 3 }
   0xc   : > { %p142_p9 = pnand %p1701_p7, %p141_p8 }
   0xd   : > { %s1703_s26 = sshll.u32 (!%p142_p9), %s2014_s16, 2  ;;  %s162_s6 = sand.u32 (!%p142_p9), 1, %s1953_s13  }
   0xe   : > { %145 = sbr.rel (%p142_p9) target bundleno = 414 (0x19e), region = 32  ;;  %p166_p10 = scmp.lt.s32.totalorder (!%p142_p9), %s1703_s26, 7 }
   0xf   : > { %s1702_s7 = sshll.u32 (!%p142_p9), %s162_s6, 5  ;;  %s1742_s9 = sshll.u32 (!%p142_p9), %s2014_s16, 9 }
  0x10   : > { %s2340_s8 = scalar_lea.vmem (!%p142_p9), [#allocation3], %s1702_s7  ;;  %s2378_s16 = scalar_lea.hbm (!%p142_p9), %s2431_s3, %s1742_s9 }
  0x11   : > { %s1636_s10 = sshll.u32 (!%p142_p9), %s2340_s8, 4  ;;  %s2388_s19 = scalar_lea.sflag (!%p142_p9), [#allocation4], %s162_s6  ;;  %s2380_s10 = int_to_ptr.vmem [resolvable:$true] %s1636_s10 }
  0x12   : > { %s1901_s20 = scalar_lea.vmem (!%p142_p9), %s2380_s10, 512  ;;  %s1970_s24 = smov (!%p142_p9), [#allocation3]  }
  0x13   : > { %v176_v0 = vld [vmem:[%s2429_s1] sm:$0x3f]  ;;  %vm190_vm0 = vcmask 1045504   ;;  %s2443_s26 = smov (!%p166_p10, %s1703_s26), 7  ;;  %vm177_vm1 = vcmask 48128   ;;  %vm769_vm2 = vcmask 982016   ;;  %p1902_p11 = scmp.ne.s32.totalorder %s2380_s10, %s1901_s20 }
  0x14   : > { %v192_v1 = vsel %vm190_vm0, %v176_v0, 0  ;;  %s1704_s27 = sshll.u32 %s2443_s26, 3  ;;  %s1905_s25 = sshll.u32 %s1970_s24, 4  ;;  %s1906_s25 = int_to_ptr.vmem [resolvable:$false] %s1905_s25 }
  0x15   : > { %v225_v2 = vand.u32 4294901760, %v192_v1  ;;  %s169_s30 = scalar_lea.vmem %s2428_s0, %s1704_s27  ;;  %p1903_p12 = pnand %p1902_p11, %p2031_p5 }
  0x16   : > { %v172_v5 = vld [vmem:[%s169_s30] sm:$0xff]  ;;  %v173_v6 = vld [vmem:[%s169_s30 + $0x8] sm:$0xff]  ;;  %v174_v7 = vld [vmem:[%s169_s30 + $0x10] sm:$0xff]  ;;  %s1907_s26 = scalar_lea.vmem %s1906_s25, 1024  ;;  %p1908_p0 = scmp.lt.s32.totalorder %s2380_s10, %s1906_s25 }
  0x17   : > { %1773 = vmatprep.subr.mxu0 %v225_v2  ;;  %v332_v3 = vsub.f32 %v192_v1, %v225_v2  ;;  %v179_v9 = vsel %vm177_vm1, %v172_v5, 0  ;;  %v182_v10 = vsel %vm177_vm1, %v173_v6, 0  ;;  %v185_v11 = vsel %vm177_vm1, %v174_v7, 0  ;;  %v175_v12 = vld [vmem:[%s169_s30 + $0x18] sm:$0xff]  ;;  %p1904_p13 = pneg %p1903_p12  ;;  %p1909_p1 = scmp.lt.s32.totalorder %s1907_s26, %s1901_s20 }
  0x18   : > { %1774 = vmatpush3.msra.mxu0 %v225_v2  ;;  %v260_v13 = vand.u32 4294901760, %v179_v9  ;;  %v270_v14 = vand.u32 4294901760, %v182_v10  ;;  %v280_v15 = vand.u32 4294901760, %v185_v11  ;;  %v188_v16 = vsel %vm177_vm1, %v175_v12, 0 }
  0x19   : > { %v333_v4 = vand.u32 4294901760, %v332_v3  ;;  %1789 = vmatprep.subr.mxu0 %v332_v3  ;;  %v290_v18 = vand.u32 4294901760, %v188_v16  ;;  %p1910_p2 = por %p1909_p1, %p1908_p0 }
  0x1a   : > { %v261_v19 = vsub.f32 %v179_v9, %v260_v13  ;;  %1783 = vmatprep.mubr.f32.mxu1 %v260_v13  ;;  %v271_v20 = vsub.f32 %v182_v10, %v270_v14  ;;  %v281_v21 = vsub.f32 %v185_v11, %v280_v15 }
  0x1b   : > { %v334_v8 = vsub.f32 %v332_v3, %v333_v4  ;;  %v291_v22 = vsub.f32 %v188_v16, %v290_v18  ;;  %p1911_p3 = pnand %p1910_p2, %p1904_p13 }
  0x1c   : > { %v262_v23 = vand.u32 4294901760, %v261_v19  ;;  %v272_v24 = vand.u32 4294901760, %v271_v20  ;;  %v282_v25 = vand.u32 4294901760, %v281_v21 }
  0x1d   : > { %v335_v17 = vand.u32 4294901760, %v334_v8  ;;  %v292_v26 = vand.u32 4294901760, %v291_v22 }
  0x1e   : > { %v263_v27 = vsub.f32 %v261_v19, %v262_v23  ;;  %v273_v28 = vsub.f32 %v271_v20, %v272_v24  ;;  %v283_v29 = vsub.f32 %v281_v21, %v282_v25 }
  0x1f   : > { %1781 = vmatprep.subr.mxu1 %v335_v17  ;;  %v293_v30 = vsub.f32 %v291_v22, %v292_v26 }
  0x20   : > { %1782 = vmatpush3.msra.mxu1 %v335_v17  ;;  %v264_v31 = vand.u32 4294901760, %v263_v27  ;;  %v274_v32 = vand.u32 4294901760, %v273_v28  ;;  %v284_v33 = vand.u32 4294901760, %v283_v29  ;;  %v777_v28 = vlaneseq }
  0x21   : > { %1784 = vmatmul.mubr.f32.vlgmr.msra.gmra.mxu1 %v270_v14  ;;  %1797 = vmatprep.subr.mxu1 %v225_v2  ;;  %v294_v34 = vand.u32 4294901760, %v293_v30 }
  0x22   : > { %1798 = vmatpush3.msra.mxu1 %v225_v2  ;;  %1786 = vmatprep.mubr.f32.mxu1 %v280_v15 }
  0x23   : > { %1813 = vmatprep.subr.mxu1 %v225_v2  ;;  %1775 = vmatprep.mubr.f32.mxu0 %v264_v31 }
  0x24   : > { %1776 = vmatmul.mubr.f32.vlgmr.msra.gmra.mxu0 %v274_v32 }
  0x25   : > { %1787 = vmatmul.mubr.f32.gmra.mxu1 %v290_v18  ;;  %1790 = vmatpush3.msra.mxu0 %v332_v3 }
  0x26   : > { %1799 = vmatprep.mubr.f32.mxu1 %v262_v23  ;;  %1778 = vmatprep.mubr.f32.mxu0 %v284_v33 }
  0x27   : > { %1805 = vmatprep.subr.mxu0 %v333_v4 }
  0x28   : > { %1779 = vmatmul.mubr.f32.gmra.mxu0 %v294_v34 }
  0x29   : > { %1800 = vmatmul.mubr.f32.vlgmr.msra.gmra.mxu1 %v272_v24  ;;  %1791 = vmatprep.mubr.f32.mxu0 %v261_v19 }
  0x2a   : > { %1814 = vmatpush3.msra.mxu1 %v225_v2  ;;  %1802 = vmatprep.mubr.f32.mxu1 %v282_v25 }
  0x2c   : > { %1792 = vmatmul.mubr.f32.vlgmr.msra.gmra.mxu0 %v271_v20 }
  0x2d   : > { %1803 = vmatmul.mubr.f32.gmra.mxu1 %v292_v26  ;;  %1806 = vmatpush3.msra.mxu0 %v333_v4 }
  0x2e   : > { %1815 = vmatprep.mubr.f32.mxu1 %v260_v13  ;;  %1794 = vmatprep.mubr.f32.mxu0 %v281_v21 }
  0x30   : > { %1795 = vmatmul.mubr.f32.gmra.mxu0 %v291_v22 }
  0x31   : > { %1816 = vmatmul.mubr.f32.vlgmr.msra.gmra.mxu1 %v270_v14  ;;  %1807 = vmatprep.mubr.f32.mxu0 %v260_v13 }
  0x32   : > { %1818 = vmatprep.mubr.f32.mxu1 %v280_v15 }
  0x34   : > { %1808 = vmatmul.mubr.f32.vlgmr.msra.gmra.mxu0 %v270_v14 }
  0x35   : > { %1819 = vmatmul.mubr.f32.gmra.mxu1 %v290_v18  ;;  %1810 = vmatprep.mubr.f32.mxu0 %v280_v15 }
  0x38   : > { %1811 = vmatmul.mubr.f32.gmra.mxu0 %v290_v18 }
  0xe1   : > { %v1785_v35 = vpop.f32.mrf.mxu1 }
  0xe3   : > { %v372_v36 = vpop.f32.mrf.mxu1 }
  0xe4   : > { %v1777_v38 = vpop.f32.mrf.mxu0 }
  0xe5   : > { %v1788_v37 = vpop.f32.mrf.mxu1  ;;  %v379_v48 = vadd.f32 %v1785_v35, %v1777_v38 }
  0xe6   : > { %v266_v40 = vpop.f32.mrf.mxu0 }
  0xe7   : > { %v384_v39 = vpop.f32.mrf.mxu1  ;;  %v373_v50 = vadd.f32 %v372_v36, %v266_v40 }
  0xe8   : > { %v1780_v42 = vpop.f32.mrf.mxu0 }
  0xe9   : > { %v1801_v41 = vpop.f32.mrf.mxu1  ;;  %v391_v54 = vadd.f32 %v1788_v37, %v1780_v42 }
  0xea   : > { %v286_v44 = vpop.f32.mrf.mxu0 }
  0xeb   : > { %v559_v43 = vpop.f32.mrf.mxu1  ;;  %v385_v57 = vadd.f32 %v384_v39, %v286_v44 }
  0xec   : > { %v1793_v46 = vpop.f32.mrf.mxu0 }
  0xed   : > { %v1804_v45 = vpop.f32.mrf.mxu1  ;;  %v472_v51 = vadd.f32 %v1793_v46, %v379_v48  ;;  %v1963_v46 = vmov 683565275  }
  0xee   : > { %v464_v49 = vpop.f32.mrf.mxu0 }
  0xef   : > { %v575_v47 = vpop.f32.mrf.mxu1  ;;  %v465_v55 = vadd.f32 %v464_v49, %v373_v50  ;;  %v568_v58 = vadd.f32 %v1801_v41, %v472_v51  ;;  %v1964_v51 = vmov 2475754826  }
  0xf0   : > { %v1796_v52 = vpop.f32.mrf.mxu0 }
  0xf1   : > { %v1817_v53 = vpop.f32.mrf.mxu1  ;;  %v486_v59 = vadd.f32 %v1796_v52, %v391_v54  ;;  %v560_v62 = vadd.f32 %v559_v43, %v465_v55 }
  0xf2   : > { %v478_v56 = vpop.f32.mrf.mxu0 }
  0xf3   : > { %v747_v61 = vpop.f32.mrf.mxu1  ;;  %v479_v63 = vadd.f32 %v478_v56, %v385_v57  ;;  %v584_v2 = vadd.f32 %v1804_v45, %v486_v59  ;;  %v1966_v57 = vmov 2102212464   ;;  %v1967_v59 = vmov 920167782  }
  0xf4   : > { %v1809_v60 = vpop.f32.mrf.mxu0 }
  0xf5   : > { %v664_v0 = vadd.f32 %v1809_v60, %v568_v58  ;;  %v1820_v6 = vpop.f32.mrf.mxu1  ;;  %v576_v7 = vadd.f32 %v575_v47, %v479_v63 }
  0xf6   : > { %v657_v1 = vpop.f32.mrf.mxu0 }
  0xf7   : > { %v754_v3 = vadd.f32 %v1817_v53, %v664_v0  ;;  %v658_v4 = vadd.f32 %v657_v1, %v560_v62  ;;  %v759_v13 = vpop.f32.mrf.mxu1  ;;  %v1965_v53 = vmov 2131351028  }
  0xf8   : > { %v1812_v5 = vpop.f32.mrf.mxu0 }
  0xf9   : > { %771 = vst.msk [vmem:[#allocation2 + $0x8] sm:$0xff] %vm769_vm2, %v754_v3  ;;  %v748_v8 = vadd.f32 %v747_v61, %v658_v4  ;;  %v676_v9 = vadd.f32 %v1812_v5, %v584_v2  ;;  %v1968_v2 = vmov 1326507024  }
  0xfa   : > { %v669_v10 = vpop.f32.mrf.mxu0 }
  0xfb   : > { %770 = vst.msk [vmem:[#allocation2] sm:$0xff] %vm769_vm2, %v748_v8  ;;  %v766_v11 = vadd.f32 %v1820_v6, %v676_v9  ;;  %v670_v12 = vadd.f32 %v669_v10, %v576_v7 }
  0xfd   : > { %773 = vst.msk [vmem:[#allocation2 + $0x18] sm:$0xff] %vm769_vm2, %v766_v11  ;;  %v760_v14 = vadd.f32 %v759_v13, %v670_v12 }
  0xff   : > { %772 = vst.msk [vmem:[#allocation2 + $0x10] sm:$0xff] %vm769_vm2, %v760_v14 }
 0x100   : > { %v2052_v15 = vld [vmem:[#allocation2 + $0x8] sm:$0xff] }
 0x101   : > { %v890_v16 = vand.u32 2147483647, %v2052_v15  ;;  %v893_v17 = vand.u32 2139095040, %v2052_v15 }
 0x102   : > { %v2056_v18 = vld [vmem:[#allocation2] sm:$0xff] }
 0x103   : > { %v786_v19 = vand.u32 2147483647, %v2056_v18  ;;  %v789_v20 = vand.u32 2139095040, %v2056_v18  ;;  %v894_v21 = vshrl.u32 %v893_v17, 23  ;;  %v897_v24 = vand.u32 8388607, %v890_v16 }
 0x104   : > { %v2067_v31 = vld [vmem:[#allocation2 + $0x18] sm:$0xff]  ;;  %vm788_vm1 = vcmp.lt.s32.totalorder %v2056_v18, 0 }
 0x105   : > { %v790_v22 = vshrl.u32 %v789_v20, 23  ;;  %v793_v23 = vand.u32 8388607, %v786_v19  ;;  %v1709_v26 = vadd.s32 4294967169, %v894_v21  ;;  %v898_v34 = vor.u32 8388608, %v897_v24 }
 0x106   : > { %v2064_v25 = vld [vmem:[#allocation2 + $0x10] sm:$0xff]  ;;  %v1101_v39 = vand.u32 2139095040, %v2067_v31 }
 0x107   : > { %v1705_v27 = vadd.s32 4294967169, %v790_v22  ;;  %v900_v29 = vadd.s32 1, %v1709_v26  ;;  %v997_v30 = vand.u32 2139095040, %v2064_v25  ;;  %v794_v32 = vor.u32 8388608, %v793_v23 }
 0x108   : > { %v2074_v43 = vshll.u32 %v898_v34, 8 }
 0x109   : > { %v796_v33 = vadd.s32 1, %v1705_v27  ;;  %vm901_vm3 = vcmp.gt.s32.totalorder %v900_v29, 0  ;;  %v998_v35 = vshrl.u32 %v997_v30, 23  ;;  %v2072_v42 = vshll.u32 %v794_v32, 8 }
 0x10a   : > { %v902_v36 = vsel %vm901_vm3, %v900_v29, 0 }
 0x10b   : > { %vm797_vm4 = vcmp.gt.s32.totalorder %v796_v33, 0  ;;  %v2069_v38 = vand.u32 31, %v902_v36  ;;  %v2076_v44 = vshrl.u32 %v902_v36, 5  ;;  %v2081_v48 = vadd.s32 4294967169, %v998_v35 }
 0x10c   : > { %v798_v37 = vsel %vm797_vm4, %v796_v33, 0 }
 0x10d   : > { %v799_v40 = vshrl.u32 %v798_v37, 5  ;;  %v800_v41 = vand.u32 31, %v798_v37  ;;  %v905_v45 = vsub.s32 32, %v2069_v38  ;;  %v907_v47 = vshll.u32 %v1963_v46, %v2069_v38 }
 0x10e   : > { %v910_v52 = vshll.u32 %v1964_v51, %v2069_v38  ;;  %v913_v54 = vshll.u32 %v1965_v53, %v2069_v38  ;;  %vm922_vm9 = vcmp.lt.s32.totalorder %v2076_v44, 1  ;;  %vm923_vm10 = vcmp.lt.s32.totalorder %v2076_v44, 2 }
 0x10f   : > { %v801_v49 = vsub.s32 32, %v800_v41  ;;  %v803_v50 = vshll.u32 %v1963_v46, %v800_v41  ;;  %v806_v55 = vshll.u32 %v1964_v51, %v800_v41  ;;  %v809_v56 = vshll.u32 %v1965_v53, %v800_v41 }
 0x110   : > { %v812_v58 = vshll.u32 %v1966_v57, %v800_v41  ;;  %v815_v60 = vshll.u32 %v1967_v59, %v800_v41  ;;  %vm818_vm5 = vcmp.lt.s32.totalorder %v799_v40, 1  ;;  %vm820_vm6 = vcmp.lt.s32.totalorder %v799_v40, 3 }
 0x111   : > { %v804_v61 = vshrl.u32 %v1964_v51, %v801_v49  ;;  %v807_v62 = vshrl.u32 %v1965_v53, %v801_v49  ;;  %v810_v63 = vshrl.u32 %v1966_v57, %v801_v49  ;;  %v802_v0 = vshrl.u32 %v1963_v46, %v801_v49 }
 0x112   : > { %v813_v1 = vshrl.u32 %v1967_v59, %v801_v49  ;;  %v816_v3 = vshrl.u32 %v1968_v2, %v801_v49  ;;  %vm821_vm7 = vcmp.lt.s32.totalorder %v799_v40, 4  ;;  %v908_v9 = vshrl.u32 %v1964_v51, %v905_v45 }
 0x113   : > { %v805_v4 = vor.u32 %v804_v61, %v803_v50  ;;  %v808_v5 = vor.u32 %v807_v62, %v806_v55  ;;  %v811_v6 = vor.u32 %v810_v63, %v809_v56  ;;  %v911_v10 = vshrl.u32 %v1965_v53, %v905_v45 }
 0x114   : > { %v814_v7 = vor.u32 %v813_v1, %v812_v58  ;;  %v817_v8 = vor.u32 %v816_v3, %v815_v60  ;;  %vm819_vm8 = vcmp.lt.s32.totalorder %v799_v40, 2  ;;  %v909_v26 = vor.u32 %v908_v9, %v907_v47  ;;  %v774_v9 = vld [vmem:[%s2430_s2] sm:$0x1] }
 0x115   : > { %v822_v11 = vsel %vm818_vm5, %v802_v0, %v805_v4  ;;  %v823_v12 = vsel %vm821_vm7, %v811_v6, 2102212464  ;;  %v826_v13 = vsel %vm818_vm5, %v805_v4, %v808_v5  ;;  %v830_v14 = vsel %vm818_vm5, %v808_v5, %v811_v6 }
 0x116   : > { %v824_v17 = vsel %vm820_vm6, %v808_v5, %v823_v12  ;;  %v827_v20 = vsel %vm821_vm7, %v814_v7, 920167782  ;;  %v831_v21 = vsel %vm821_vm7, %v817_v8, 1326507024  ;;  %v912_v30 = vor.u32 %v911_v10, %v910_v52 }
 0x117   : > { %v825_v22 = vsel %vm819_vm8, %v822_v11, %v824_v17  ;;  %v828_v23 = vsel %vm820_vm6, %v811_v6, %v827_v20  ;;  %v832_v24 = vsel %vm820_vm6, %v814_v7, %v831_v21  ;;  %v914_v32 = vshrl.u32 %v1966_v57, %v905_v45 }
 0x118   : > { %v829_v27 = vsel %vm819_vm8, %v826_v13, %v828_v23  ;;  %v833_v29 = vsel %vm819_vm8, %v830_v14, %v832_v24  ;;  %v906_v37 = vshrl.u32 %v1963_v46, %v905_v45  ;;  %v916_v40 = vshll.u32 %v1966_v57, %v2069_v38 }
 0x119   : > { %v2108_v33 = vmul.u32.u64.low %v2072_v42, %v833_v29  ;;  %v2109_v34 = vmul.u32.u64.high %v2072_v42, %v833_v29, %v2108_v33  ;;  %v2112_v35 = vmul.u32.u64.low %v2072_v42, %v829_v27  ;;  %v2113_v36 = vmul.u32.u64.high %v2072_v42, %v829_v27, %v2112_v35 }
 0x11a   : > { %v915_v41 = vor.u32 %v914_v32, %v913_v54  ;;  %v917_v47 = vshrl.u32 %v1967_v59, %v905_v45  ;;  %v841_v49 = vmul.u32 %v2072_v42, %v825_v22  ;;  %v919_v50 = vshll.u32 %v1967_v59, %v2069_v38 }
 0x11b   : > { %v920_v52 = vshrl.u32 %v1968_v2, %v905_v45  ;;  %vm924_vm11 = vcmp.lt.s32.totalorder %v2076_v44, 3  ;;  %vm925_vm12 = vcmp.lt.s32.totalorder %v2076_v44, 4  ;;  %vm843_vm13 = vc.u32 %v2109_v34, %v2112_v35 }
 0x11c   : > { %v918_v55 = vor.u32 %v917_v47, %v916_v40  ;;  %v844_v54 = vadd.s32 1, %v2113_v36  ;;  %v930_v56 = vsel %vm922_vm9, %v909_v26, %v912_v30  ;;  %v927_v58 = vsel %vm925_vm12, %v915_v41, 2102212464 }
 0x11d   : > { %v921_v42 = vor.u32 %v920_v52, %v919_v50  ;;  %v934_v60 = vsel %vm922_vm9, %v912_v30, %v915_v41  ;;  %v1004_v45 = vadd.s32 1, %v2081_v48  ;;  %v926_v62 = vsel %vm922_vm9, %v906_v37, %v909_v26 }
 0x11e   : > { %v931_v38 = vsel %vm925_vm12, %v918_v55, 920167782  ;;  %v845_v61 = vsel %vm843_vm13, %v844_v54, %v2113_v36  ;;  %v928_v3 = vsel %vm924_vm11, %v912_v30, %v927_v58  ;;  %v994_v8 = vand.u32 2147483647, %v2064_v25 }
 0x11f   : > { %v932_v63 = vsel %vm924_vm11, %v915_v41, %v931_v38  ;;  %v935_v0 = vsel %vm925_vm12, %v921_v42, 1326507024  ;;  %v846_v1 = vadd.s32 %v845_v61, %v841_v49  ;;  %vm1005_vm14 = vcmp.gt.s32.totalorder %v1004_v45, 0 }
 0x120   : > { %v933_v4 = vsel %vm923_vm10, %v930_v56, %v932_v63  ;;  %v936_v5 = vsel %vm924_vm11, %v918_v55, %v935_v0  ;;  %v929_v13 = vsel %vm923_vm10, %v926_v62, %v928_v3  ;;  %v1006_v14 = vsel %vm1005_vm14, %v1004_v45, 0 }
 0x121   : > { %v937_v48 = vsel %vm923_vm10, %v934_v60, %v936_v5  ;;  %v2144_v6 = vmul.u32.u64.low %v2074_v43, %v933_v4  ;;  %v2145_v7 = vmul.u32.u64.high %v2074_v43, %v933_v4, %v2144_v6  ;;  %v847_v10 = vadd.s32 536870912, %v846_v1 }
 0x122   : > { %v2153_v11 = vmul.u32.u64.low %v2074_v43, %v937_v48  ;;  %v2154_v12 = vmul.u32.u64.high %v2074_v43, %v937_v48, %v2153_v11  ;;  %v1102_v17 = vshrl.u32 %v1101_v39, 23  ;;  %v1008_v21 = vand.u32 31, %v1006_v14 }
 0x123   : > { %v2160_v20 = vshrl.u32 %v847_v10, 30  ;;  %vm775_vm15 = vcmp.gt.f32.partialorder %v774_v9, 0.0  ;;  %v778_v22 = vshrl.u32 %v777_v28, 7  ;;  %v948_v23 = vadd.s32 1, %v2145_v7 }
 0x124   : > { %v945_v26 = vmul.u32 %v2074_v43, %v929_v13  ;;  %vm947_vm0 = vc.u32 %v2154_v12, %v2144_v6  ;;  %v1001_v44 = vand.u32 8388607, %v994_v8  ;;  %v1009_v27 = vsub.s32 32, %v1008_v21 }
 0x125   : > { %v849_v24 = vshll.u32 %v2160_v20, 30  ;;  %v949_v39 = vsel %vm947_vm0, %v948_v23, %v2145_v7  ;;  %v1717_v29 = vadd.s32 4294967169, %v1102_v17  ;;  %v1969_v28 = vmov 0  }
 0x126   : > { %v950_v32 = vadd.s32 %v949_v39, %v945_v26  ;;  %v776_v33 = vsel %vm775_vm15, 1, %v1969_v28  ;;  %v779_v36 = vsub.s32 0, %v778_v22  ;;  %v1012_v37 = vshrl.u32 %v1964_v51, %v1009_v27 }
 0x127   : > { %v2171_v30 = vsub.s32 %v846_v1, %v849_v24  ;;  %v1002_v40 = vor.u32 8388608, %v1001_v44  ;;  %v1015_v47 = vshrl.u32 %v1965_v53, %v1009_v27  ;;  %v1011_v49 = vshll.u32 %v1963_v46, %v1008_v21 }
 0x128   : > { %v951_v41 = vadd.s32 536870912, %v950_v32  ;;  %v1014_v50 = vshll.u32 %v1964_v51, %v1008_v21  ;;  %v1021_v52 = vshrl.u32 %v1967_v59, %v1009_v27  ;;  %v1108_v55 = vadd.s32 1, %v1717_v29 }
 0x129   : > { %v852_v43 = vsub.s32 0, %v2171_v30  ;;  %v1018_v56 = vshrl.u32 %v1966_v57, %v1009_v27  ;;  %v1020_v58 = vshll.u32 %v1966_v57, %v1008_v21  ;;  %v2184_v38 = vrot.slane %v776_v33, %v779_v36 }
 0x12a   : > { %v2180_v42 = vshrl.u32 %v951_v41, 30  ;;  %v1007_v60 = vshrl.u32 %v1006_v14, 5  ;;  %v1013_v45 = vor.u32 %v1012_v37, %v1011_v49  ;;  %v1017_v61 = vshll.u32 %v1965_v53, %v1008_v21 }
 0x12b   : > { %v1706_v54 = vmin.u32 %v852_v43, %v2171_v30  ;;  %v1016_v63 = vor.u32 %v1015_v47, %v1014_v50  ;;  %v1022_v0 = vor.u32 %v1021_v52, %v1020_v58  ;;  %v1024_v1 = vshrl.u32 %v1968_v2, %v1009_v27 }
 0x12c   : > { %v842_v3 = vadd.s32 %v2112_v35, %v2109_v34  ;;  %v953_v4 = vshll.u32 %v2180_v42, 30  ;;  %v2192_v5 = vshll.u32 %v1002_v40, 8  ;;  %v1098_v48 = vand.u32 2147483647, %v2067_v31 }
 0x12d   : > { %v854_v62 = vclz %v1706_v54  ;;  %v1019_v9 = vor.u32 %v1018_v56, %v1017_v61  ;;  %v1023_v10 = vshll.u32 %v1967_v59, %v1008_v21  ;;  %vm1109_vm3 = vcmp.gt.s32.totalorder %v1108_v55, 0 }
 0x12e   : > { %v872_v11 = vsub.s32 4, %v2160_v20  ;;  %v2197_v13 = vsub.s32 %v950_v32, %v953_v4  ;;  %vm1026_vm4 = vcmp.lt.s32.totalorder %v1007_v60, 1  ;;  %vm1029_vm5 = vcmp.lt.s32.totalorder %v1007_v60, 4 }
 0x12f   : > { %v1707_v7 = vadd.s32 4294967294, %v854_v62  ;;  %v1025_v14 = vor.u32 %v1024_v1, %v1023_v10  ;;  %v1034_v34 = vsel %vm1026_vm4, %v1013_v45, %v1016_v63  ;;  %v1035_v35 = vsel %vm1029_vm5, %v1022_v0, 920167782 }
 0x130   : > { %vm2203_vm7 = vcmp.le.f32.partialorder %v786_v19, 0.7853982  ;;  %v956_v22 = vsub.s32 0, %v2197_v13  ;;  %vm1027_vm8 = vcmp.lt.s32.totalorder %v1007_v60, 2  ;;  %vm1028_vm9 = vcmp.lt.s32.totalorder %v1007_v60, 3 }
 0x131   : > { %vm1708_vm6 = vcmp.lt.s32.totalorder %v1707_v7, 0  ;;  %v1031_v26 = vsel %vm1029_vm5, %v1019_v9, 2102212464  ;;  %v1036_v44 = vsel %vm1028_vm9, %v1019_v9, %v1035_v35  ;;  %v1010_v19 = vshrl.u32 %v1963_v46, %v1009_v27 }
 0x132   : > { %v857_v21 = vsel %vm1708_vm6, 0, %v1707_v7  ;;  %v1710_v29 = vmin.u32 %v956_v22, %v2197_v13  ;;  %v1037_v32 = vsel %vm1027_vm8, %v1034_v34, %v1036_v44  ;;  %v1038_v36 = vsel %vm1026_vm4, %v1016_v63, %v1019_v9 }
 0x133   : > { %v858_v23 = vsub.s32 32, %v857_v21  ;;  %v862_v24 = vsub.s32 4294967266, %v857_v21  ;;  %v859_v39 = vshll.u32 %v2171_v30, %v857_v21  ;;  %v1039_v37 = vsel %vm1029_vm5, %v1025_v14, 1326507024 }
 0x134   : > { %v873_v43 = vsel %vm788_vm1, %v872_v11, %v2160_v20  ;;  %v958_v41 = vclz %v1710_v29  ;;  %v1030_v40 = vsel %vm1026_vm4, %v1010_v19, %v1013_v45  ;;  %v1032_v30 = vsel %vm1028_vm9, %v1016_v63, %v1031_v26 }
 0x135   : > { %v860_v28 = vshrl.u32 %v842_v3, %v858_v23  ;;  %v863_v33 = vadd.s32 127, %v862_v24  ;;  %vm892_vm10 = vcmp.lt.s32.totalorder %v2052_v15, 0  ;;  %v1040_v27 = vsel %vm1028_vm9, %v1022_v0, %v1039_v37 }
 0x136   : > { %v1110_v50 = vsel %vm1109_vm3, %v1108_v55, 0  ;;  %v1711_v52 = vadd.s32 4294967294, %v958_v41  ;;  %v1041_v54 = vsel %vm1027_vm8, %v1038_v36, %v1040_v27  ;;  %v1105_v62 = vand.u32 8388607, %v1098_v48 }
 0x137   : > { %v861_v47 = vor.u32 %v860_v28, %v859_v39  ;;  %v864_v49 = vshll.u32 %v863_v33, 23  ;;  %v2226_v56 = vmul.u32.u64.low %v2192_v5, %v1037_v32  ;;  %v2227_v58 = vmul.u32.u64.high %v2192_v5, %v1037_v32, %v2226_v56 }
 0x138   : > { %v2231_v45 = vmul.u32.u64.low %v2192_v5, %v1041_v54  ;;  %v2232_v61 = vmul.u32.u64.high %v2192_v5, %v1041_v54, %v2231_v45  ;;  %v946_v63 = vadd.s32 %v2144_v6, %v2154_v12  ;;  %vm1712_vm11 = vcmp.lt.s32.totalorder %v1711_v52, 0 }
 0x139   : > { %v865_v20 = vor.u32 4788187, %v864_v49  ;;  %v1033_v55 = vsel %vm1027_vm8, %v1030_v40, %v1032_v30  ;;  %v1112_v0 = vand.u32 31, %v1110_v50  ;;  %v868_v3 = vcvt.s32.f32 %v861_v47 }
 0x13a   : > { %v2241_v4 = vsel %vm2203_vm7, 0, %v873_v43  ;;  %v961_v7 = vsel %vm1712_vm11, 0, %v1711_v52  ;;  %v976_v11 = vsub.s32 4, %v2180_v42  ;;  %v1052_v14 = vadd.s32 1, %v2227_v58 }
 0x13b   : > { %v866_v1 = vand.u32 2147483647, %v865_v20  ;;  %v962_v9 = vsub.s32 32, %v961_v7  ;;  %v966_v10 = vsub.s32 4294967266, %v961_v7  ;;  %v1049_v6 = vmul.u32 %v2192_v5, %v1033_v55 }
 0x13c   : > { %vm1051_vm12 = vc.u32 %v2232_v61, %v2226_v56  ;;  %v1113_v12 = vsub.s32 32, %v1112_v0  ;;  %v963_v60 = vshll.u32 %v2197_v13, %v961_v7  ;;  %v879_v24 = vadd.s32 3, %v2241_v4 }
 0x13d   : > { %v869_v34 = vmul.f32 %v868_v3, %v866_v1  ;;  %v964_v35 = vshrl.u32 %v946_v63, %v962_v9  ;;  %v967_v21 = vadd.s32 127, %v966_v10  ;;  %v1053_v22 = vsel %vm1051_vm12, %v1052_v14, %v2227_v58 }
 0x13e   : > { %v1054_v26 = vadd.s32 %v1053_v22, %v1049_v6  ;;  %v1106_v44 = vor.u32 8388608, %v1105_v62  ;;  %vm2253_vm13 = vcmp.le.f32.partialorder %v890_v16, 0.7853982  ;;  %v977_v13 = vsel %vm892_vm10, %v976_v11, %v2180_v42 }
 0x13f   : > { %v870_v23 = vxor.u32 2147483648, %v869_v34  ;;  %v965_v5 = vor.u32 %v964_v35, %v963_v60  ;;  %v968_v29 = vshll.u32 %v967_v21, 23  ;;  %v1111_v19 = vshrl.u32 %v1110_v50, 5 }
 0x140   : > { %v1055_v28 = vadd.s32 536870912, %v1054_v26  ;;  %v1115_v33 = vshll.u32 %v1963_v46, %v1112_v0  ;;  %v1116_v36 = vshrl.u32 %v1964_v51, %v1113_v12  ;;  %v1119_v43 = vshrl.u32 %v1965_v53, %v1113_v12 }
 0x141   : > { %v871_v32 = vsel %vm788_vm1, %v870_v23, %v869_v34  ;;  %v969_v37 = vor.u32 4788187, %v968_v29  ;;  %v1121_v41 = vshll.u32 %v1965_v53, %v1112_v0  ;;  %v972_v42 = vcvt.s32.f32 %v965_v5 }
 0x142   : > { %v874_v16 = vsel %vm2203_vm7, %v2056_v18, %v871_v32  ;;  %v2269_v40 = vshrl.u32 %v1055_v28, 30  ;;  %v1122_v30 = vshrl.u32 %v1966_v57, %v1113_v12  ;;  %v1124_v49 = vshll.u32 %v1966_v57, %v1112_v0 }
 0x143   : > { %1885 = vcosq.f32 %v874_v16  ;;  %v970_v47 = vand.u32 2147483647, %v969_v37  ;;  %v1125_v27 = vshrl.u32 %v1967_v59, %v1113_v12  ;;  %v1118_v50 = vshll.u32 %v1964_v51, %v1112_v0 }
 0x144   : > { %1887 = vsinq.f32 %v874_v16  ;;  %v1057_v17 = vshll.u32 %v2269_v40, 30  ;;  %v1123_v52 = vor.u32 %v1122_v30, %v1121_v41  ;;  %v1128_v54 = vshrl.u32 %v1968_v2, %v1113_v12 }
 0x145   : > { %v973_v53 = vmul.f32 %v972_v42, %v970_v47  ;;  %v1117_v58 = vor.u32 %v1116_v36, %v1115_v33  ;;  %v1126_v20 = vor.u32 %v1125_v27, %v1124_v49  ;;  %v1127_v45 = vshll.u32 %v1967_v59, %v1112_v0 }
 0x146   : > { %v2278_v62 = vand.u32 3, %v879_v24  ;;  %v2280_v63 = vsub.s32 %v1054_v26, %v1057_v17  ;;  %v1120_v55 = vor.u32 %v1119_v43, %v1118_v50  ;;  %v2282_v57 = vshll.u32 %v1106_v44, 8 }
 0x147   : > { %v974_v1 = vxor.u32 2147483648, %v973_v53  ;;  %v1114_v3 = vshrl.u32 %v1963_v46, %v1113_v12  ;;  %v1129_v7 = vor.u32 %v1128_v54, %v1127_v45  ;;  %vm1133_vm14 = vcmp.lt.s32.totalorder %v1111_v19, 4 }
 0x148   : > { %v2287_v51 = vsel %vm2253_vm13, 0, %v977_v13  ;;  %v1060_v2 = vsub.s32 0, %v2280_v63  ;;  %vm1130_vm15 = vcmp.lt.s32.totalorder %v1111_v19, 1  ;;  %v1135_v59 = vsel %vm1133_vm14, %v1123_v52, 2102212464 }
 0x149   : > { %v975_v0 = vsel %vm892_vm10, %v974_v1, %v973_v53  ;;  %vm1132_vm0 = vcmp.lt.s32.totalorder %v1111_v19, 3  ;;  %v1134_v9 = vsel %vm1130_vm15, %v1114_v3, %v1117_v58  ;;  %v1139_v10 = vsel %vm1133_vm14, %v1126_v20, 920167782 }
 0x14a   : > { %v978_v46 = vsel %vm2253_vm13, %v2052_v15, %v975_v0  ;;  %v1714_v11 = vmin.u32 %v1060_v2, %v2280_v63  ;;  %v1136_v14 = vsel %vm1132_vm0, %v1120_v55, %v1135_v59  ;;  %v1138_v34 = vsel %vm1130_vm15, %v1117_v58, %v1120_v55 }
 0x14b   : > { %vm881_vm1 = vcmp.lt.s32.totalorder %v2278_v62, 2  ;;  %1889 = vcosq.f32 %v978_v46  ;;  %v1140_v6 = vsel %vm1132_vm0, %v1123_v52, %v1139_v10  ;;  %v1142_v12 = vsel %vm1130_vm15, %v1120_v55, %v1123_v52 }
 0x14c   : > { %v1143_v60 = vsel %vm1133_vm14, %v1129_v7, 1326507024  ;;  %vm878_vm3 = vweird.f32 %v2056_v18  ;;  %1891 = vsinq.f32 %v978_v46  ;;  %v983_v35 = vadd.s32 3, %v2287_v51 }
 0x14d   : > { %v1062_v21 = vclz %v1714_v11  ;;  %vm1131_vm4 = vcmp.lt.s32.totalorder %v1111_v19, 2  ;;  %v1144_v24 = vsel %vm1132_vm0, %v1126_v20, %v1143_v60  ;;  %v1295_v26 = vand.u32 3, %v2241_v4 }
 0x14e   : > { %v1137_v22 = vsel %vm1131_vm4, %v1134_v9, %v1136_v14  ;;  %v1141_v23 = vsel %vm1131_vm4, %v1138_v34, %v1140_v6  ;;  %v1145_v39 = vsel %vm1131_vm4, %v1142_v12, %v1144_v24  ;;  %vm882_vm5 = vcmp.eq.s32.totalorder %v2278_v62, 0 }
 0x14f   : > { %v1715_v44 = vadd.s32 4294967294, %v1062_v21  ;;  %v2307_v5 = vmul.u32.u64.low %v2282_v57, %v1141_v23  ;;  %v2308_v29 = vmul.u32.u64.high %v2282_v57, %v1141_v23, %v2307_v5  ;;  %vm885_vm6 = vcmp.eq.s32.totalorder %v2278_v62, 2 }
 0x150   : > { %v1886_v13 = vpop.eup %1885  ;;  %v2314_v32 = vmul.u32.u64.low %v2282_v57, %v1145_v39  ;;  %v2315_v28 = vmul.u32.u64.high %v2282_v57, %v1145_v39, %v2314_v32  ;;  %v984_v4 = vand.u32 3, %v983_v35  ;;  %v1050_v36 = vadd.s32 %v2226_v56, %v2232_v61 }
 0x151   : > { %v1888_v19 = vpop.eup %1887  ;;  %v886_v33 = vxor.u32 2147483648, %v1886_v13  ;;  %vm1716_vm7 = vcmp.lt.s32.totalorder %v1715_v44, 0  ;;  %v1153_v43 = vmul.u32 %v2282_v57, %v1137_v22  ;;  %vm1297_vm8 = vcmp.eq.s32.totalorder %v1295_v26, 0 }
 0x152   : > { %v883_v16 = vxor.u32 2147483648, %v1888_v19  ;;  %v1065_v37 = vsel %vm1716_vm7, 0, %v1715_v44  ;;  %vm1300_vm9 = vcmp.eq.s32.totalorder %v1295_v26, 2  ;;  %vm1155_vm10 = vc.u32 %v2315_v28, %v2307_v5 }
 0x153   : > { %v887_v41 = vsel %vm885_vm6, %v886_v33, %v1888_v19  ;;  %v1066_v42 = vsub.s32 32, %v1065_v37  ;;  %v1070_v30 = vsub.s32 4294967266, %v1065_v37  ;;  %v1067_v49 = vshll.u32 %v2280_v63, %v1065_v37 }
 0x154   : > { %v884_v47 = vsel %vm882_vm5, %v1886_v13, %v883_v16  ;;  %v1156_v56 = vadd.s32 1, %v2308_v29  ;;  %v1299_v50 = vsel %vm1297_vm8, %v1886_v13, %v883_v16  ;;  %vm1296_vm11 = vcmp.lt.s32.totalorder %v1295_v26, 2 }
 0x155   : > { %v888_v61 = vsel %vm881_vm1, %v884_v47, %v887_v41  ;;  %v1068_v27 = vshrl.u32 %v1050_v36, %v1066_v42  ;;  %v1071_v17 = vadd.s32 127, %v1070_v30  ;;  %v1302_v53 = vsel %vm1300_vm9, %v886_v33, %v1888_v19 }
 0x156   : > { %v889_v52 = vsel %vm878_vm3, nan, %v888_v61  ;;  %v1157_v54 = vsel %vm1155_vm10, %v1156_v56, %v2308_v29  ;;  %v1303_v63 = vsel %vm1296_vm11, %v1299_v50, %v1302_v53  ;;  %vm781_vm12 = vcmp.eq.s32.totalorder %v2184_v38, 1 }
 0x157   : > { %v1069_v58 = vor.u32 %v1068_v27, %v1067_v49  ;;  %v1072_v20 = vshll.u32 %v1071_v17, 23  ;;  %v1158_v45 = vadd.s32 %v1157_v54, %v1153_v43  ;;  %v1304_v62 = vsel %vm878_vm3, nan, %v1303_v63 }
 0x158   : > { %v1398_v55 = vand.u32 3, %v2287_v51  ;;  %v1890_v57 = vpop.eup %1889  ;;  %v1614_v7 = vsel %vm781_vm12, %v889_v52, %v1304_v62  ;;  %vm985_vm13 = vcmp.lt.s32.totalorder %v984_v4, 2  ;;  %vm989_vm14 = vcmp.eq.s32.totalorder %v984_v4, 2 }
 0x159   : > { %v1073_v1 = vor.u32 4788187, %v1072_v20  ;;  %v1159_v3 = vadd.s32 536870912, %v1158_v45  ;;  %v1892_v2 = vpop.eup %1891  ;;  %v990_v59 = vxor.u32 2147483648, %v1890_v57  ;;  %1618 = vst.msk [vmem:[%s2340_s8] sm:$0xff] %vm769_vm2, %v1614_v7  ;;  %v1076_v9 = vcvt.s32.f32 %v1069_v58 }
 0x15a   : > { %v987_v0 = vxor.u32 2147483648, %v1892_v2  ;;  %vm986_vm15 = vcmp.eq.s32.totalorder %v984_v4, 0  ;;  %vm1400_vm0 = vcmp.eq.s32.totalorder %v1398_v55, 0  ;;  %vm1403_vm1 = vcmp.eq.s32.totalorder %v1398_v55, 2 }
 0x15b   : > { %v1074_v18 = vand.u32 2147483647, %v1073_v1  ;;  %v2344_v10 = vshrl.u32 %v1159_v3, 30  ;;  %v991_v51 = vsel %vm989_vm14, %v990_v59, %v1892_v2  ;;  %v1405_v34 = vsel %vm1403_vm1, %v990_v59, %v1892_v2 }
 0x15c   : > { %v988_v46 = vsel %vm986_vm15, %v1890_v57, %v987_v0  ;;  %vm982_vm3 = vweird.f32 %v2052_v15  ;;  %v1080_v12 = vsub.s32 4, %v2269_v40  ;;  %v1402_v60 = vsel %vm1400_vm0, %v1890_v57, %v987_v0 }
 0x15d   : > { %v1077_v11 = vmul.f32 %v1076_v9, %v1074_v18  ;;  %v1161_v14 = vshll.u32 %v2344_v10, 30  ;;  %v992_v6 = vsel %vm985_vm13, %v988_v46, %v991_v51  ;;  %vm1399_vm4 = vcmp.lt.s32.totalorder %v1398_v55, 2 }
 0x15e   : > { %v993_v35 = vsel %vm982_vm3, nan, %v992_v6  ;;  %vm996_vm5 = vcmp.lt.s32.totalorder %v2064_v25, 0  ;;  %v1406_v23 = vsel %vm1399_vm4, %v1402_v60, %v1405_v34  ;;  %vm995_vm6 = vcmp.le.f32.partialorder %v994_v8, 0.7853982 }
 0x15f   : > { %v1078_v21 = vxor.u32 2147483648, %v1077_v11  ;;  %v1162_v22 = vsub.s32 %v1158_v45, %v1161_v14  ;;  %v1407_v44 = vsel %vm982_vm3, nan, %v1406_v23  ;;  %v1081_v29 = vsel %vm996_vm5, %v1080_v12, %v2269_v40 }
 0x160   : > { %v1615_v39 = vsel %vm781_vm12, %v993_v35, %v1407_v44  ;;  %v1083_v19 = vsel %vm995_vm6, 0, %v1081_v29  ;;  %v1154_v36 = vadd.s32 %v2307_v5, %v2315_v28  ;;  %vm1086_vm15 = vweird.f32 %v2064_v25 }
 0x161   : > { %v1079_v24 = vsel %vm996_vm5, %v1078_v21, %v1077_v11  ;;  %v1164_v26 = vsub.s32 0, %v1162_v22  ;;  %1619 = vst.msk [vmem:[%s2340_s8 + $0x8] sm:$0xff] %vm769_vm2, %v1615_v39  ;;  %v1087_v4 = vadd.s32 3, %v1083_v19  ;;  %v1501_v30 = vand.u32 3, %v1083_v19 }
 0x162   : > { %v1082_v15 = vsel %vm995_vm6, %v2064_v25, %v1079_v24  ;;  %vm1100_vm0 = vcmp.lt.s32.totalorder %v2067_v31, 0  ;;  %v1184_v3 = vsub.s32 4, %v2344_v10  ;;  %vm1099_vm1 = vcmp.le.f32.partialorder %v1098_v48, 0.7853982 }
 0x163   : > { %1893 = vcosq.f32 %v1082_v15  ;;  %v1718_v13 = vmin.u32 %v1164_v26, %v1162_v22  ;;  %v1088_v43 = vand.u32 3, %v1087_v4  ;;  %vm1503_vm10 = vcmp.eq.s32.totalorder %v1501_v30, 0 }
 0x164   : > { %1895 = vsinq.f32 %v1082_v15  ;;  %vm1506_vm11 = vcmp.eq.s32.totalorder %v1501_v30, 2  ;;  %vm1502_vm14 = vcmp.lt.s32.totalorder %v1501_v30, 2  ;;  %v1185_v2 = vsel %vm1100_vm0, %v1184_v3, %v2344_v10 }
 0x165   : > { %v1166_v32 = vclz %v1718_v13  ;;  %vm1090_vm8 = vcmp.eq.s32.totalorder %v1088_v43, 0  ;;  %vm1093_vm9 = vcmp.eq.s32.totalorder %v1088_v43, 2  ;;  %vm1089_vm13 = vcmp.lt.s32.totalorder %v1088_v43, 2 }
 0x166   : > { %v1187_v59 = vsel %vm1099_vm1, 0, %v1185_v2 }
 0x167   : > { %v1719_v33 = vadd.s32 4294967294, %v1166_v32  ;;  %v1191_v0 = vadd.s32 3, %v1187_v59  ;;  %v1604_v9 = vand.u32 3, %v1187_v59 }
 0x169   : > { %vm1720_vm7 = vcmp.lt.s32.totalorder %v1719_v33, 0  ;;  %v1192_v18 = vand.u32 3, %v1191_v0  ;;  %vm1609_vm4 = vcmp.eq.s32.totalorder %v1604_v9, 2  ;;  %vm1606_vm6 = vcmp.eq.s32.totalorder %v1604_v9, 0 }
 0x16a   : > { %v1169_v8 = vsel %vm1720_vm7, 0, %v1719_v33 }
 0x16b   : > { %v1170_v16 = vsub.s32 32, %v1169_v8  ;;  %v1174_v37 = vsub.s32 4294967266, %v1169_v8  ;;  %v1171_v41 = vshll.u32 %v1162_v22, %v1169_v8  ;;  %vm1197_vm3 = vcmp.eq.s32.totalorder %v1192_v18, 2 }
 0x16c   : > { %vm1194_vm5 = vcmp.eq.s32.totalorder %v1192_v18, 0  ;;  %vm1193_vm7 = vcmp.lt.s32.totalorder %v1192_v18, 2 }
 0x16d   : > { %v1172_v42 = vshrl.u32 %v1154_v36, %v1170_v16  ;;  %v1175_v40 = vadd.s32 127, %v1174_v37 }
 0x16f   : > { %v1173_v47 = vor.u32 %v1172_v42, %v1171_v41  ;;  %v1176_v49 = vshll.u32 %v1175_v40, 23 }
 0x170   : > { %v1894_v56 = vpop.eup %1893 }
 0x171   : > { %v1896_v61 = vpop.eup %1895  ;;  %v1094_v27 = vxor.u32 2147483648, %v1894_v56  ;;  %v1177_v17 = vor.u32 4788187, %v1176_v49  ;;  %v1180_v28 = vcvt.s32.f32 %v1173_v47 }
 0x172   : > { %v1091_v50 = vxor.u32 2147483648, %v1896_v61 }
 0x173   : > { %v1095_v52 = vsel %vm1093_vm9, %v1094_v27, %v1896_v61  ;;  %v1178_v5 = vand.u32 2147483647, %v1177_v17  ;;  %v1508_v54 = vsel %vm1506_vm11, %v1094_v27, %v1896_v61  ;;  %vm1190_vm9 = vweird.f32 %v2067_v31 }
 0x174   : > { %v1092_v53 = vsel %vm1090_vm8, %v1894_v56, %v1091_v50  ;;  %v1505_v58 = vsel %vm1503_vm10, %v1894_v56, %v1091_v50  ;;  %vm1605_vm8 = vcmp.lt.s32.totalorder %v1604_v9, 2 }
 0x175   : > { %v1096_v20 = vsel %vm1089_vm13, %v1092_v53, %v1095_v52  ;;  %v1181_v45 = vmul.f32 %v1180_v28, %v1178_v5  ;;  %v1509_v63 = vsel %vm1502_vm14, %v1505_v58, %v1508_v54 }
 0x176   : > { %v1097_v62 = vsel %vm1086_vm15, nan, %v1096_v20  ;;  %v1510_v55 = vsel %vm1086_vm15, nan, %v1509_v63 }
 0x177   : > { %v1182_v57 = vxor.u32 2147483648, %v1181_v45  ;;  %v1616_v1 = vsel %vm781_vm12, %v1097_v62, %v1510_v55 }
 0x178   : > { %1620 = vst.msk [vmem:[%s2340_s8 + $0x10] sm:$0xff] %vm769_vm2, %v1616_v1 }
 0x179   : > { %v1183_v25 = vsel %vm1100_vm0, %v1182_v57, %v1181_v45 }
 0x17a   : > { %v1186_v7 = vsel %vm1099_vm1, %v2067_v31, %v1183_v25 }
 0x17b   : > { %1897 = vcosq.f32 %v1186_v7 }
 0x17c   : > { %1899 = vsinq.f32 %v1186_v7 }
 0x188   : > { %v1898_v51 = vpop.eup %1897 }
 0x189   : > { %v1900_v46 = vpop.eup %1899  ;;  %v1198_v11 = vxor.u32 2147483648, %v1898_v51 }
 0x18a   : > { %v1195_v14 = vxor.u32 2147483648, %v1900_v46 }
 0x18b   : > { %v1199_v48 = vsel %vm1197_vm3, %v1198_v11, %v1900_v46  ;;  %v1611_v34 = vsel %vm1609_vm4, %v1198_v11, %v1900_v46 }
 0x18c   : > { %v1196_v10 = vsel %vm1194_vm5, %v1898_v51, %v1195_v14  ;;  %v1608_v6 = vsel %vm1606_vm6, %v1898_v51, %v1195_v14 }
 0x18d   : > { %v1200_v12 = vsel %vm1193_vm7, %v1196_v10, %v1199_v48  ;;  %v1612_v60 = vsel %vm1605_vm8, %v1608_v6, %v1611_v34 }
 0x18e   : > { %v1201_v35 = vsel %vm1190_vm9, nan, %v1200_v12  ;;  %v1613_v21 = vsel %vm1190_vm9, nan, %v1612_v60 }
 0x18f   : > { %v1617_v22 = vsel %vm781_vm12, %v1201_v35, %v1613_v21 }
 0x190   : > { %1621 = vst.msk [vmem:[%s2340_s8 + $0x18] sm:$0xff] %vm769_vm2, %v1617_v22 }
 0x191   : > { %1914 = shalt.err (!%p1911_p3)
}
 0x192   : > { %s1915_s27 = scalar_lea.hbm %s2378_s16, 512  ;;  %s1919_s30 = scalar_lea.hbm %s2431_s3, 1024 }
 0x193   : > { %p1916_p4 = scmp.ne.s32.totalorder %s2378_s16, %s1915_s27  ;;  %p1920_p9 = scmp.lt.s32.totalorder %s2378_s16, %s2431_s3 }
 0x194   : > { %p1921_p10 = scmp.lt.s32.totalorder %s1919_s30, %s1915_s27 }
 0x195   : > { %p1917_p7 = pnand %p1916_p4, %p2031_p5 }
 0x196   : > { %p1922_p11 = por %p1921_p10, %p1920_p9 }
 0x197   : > { %p1918_p8 = pneg %p1917_p7 }
 0x199   : > { %p1923_p12 = pnand %p1922_p11, %p1918_p8 }
 0x19b   : > { %1926 = shalt.err (!%p1923_p12)
}
 0x19c   : > { %s1971_s6 = smov 128   ;;  %s1972_s7 = smov 8  }
 0x19d   : > { %1837 = dma.vmem_to_hbm [thread:$0]  (%p2031_p5), %s2380_s10, 512, %s2378_s16, %s2388_s19, %s1971_s6, %s1971_s6, %s1972_s7  }
 0x19e PF: > { %p1843_p13 = scmp.ge.s32.totalorder %s1961_s15, 2  ;;  %s1651_s8 = sand.u32 1, %s1949_s12  }
 0x19f   : > { %s1652_s9 = scalar_lea.sflag [#allocation4], %s1651_s8 }
 0x1a0   : > { %p1840_p0 = pnand %p1843_p13, %p2035_p6 }
 0x1a2   : > { %p1841_p1 = pneg %p1840_p0 }
 0x1a4   : > { %1944 = dma.done.wait (%p1841_p1), %s1652_s9, 512  }
 0x1a5   : > { %1946 = vsyncadd (%p1841_p1), %s1652_s9, 4294966784  ;;  %p13_p2 = scmp.ge.s32.totalorder %s2018_s18, 4   ;;  %s2438_s12 = smov %s1953_s13 }
 0x1a6   : > { %s2439_s13 = smov %s1957_s14  ;;  %s2440_s14 = smov %s2029_s21 }
 0x1a7   : > { %s2441_s15 = smov %s2018_s18  ;;  %15 = sbr.rel (!%p13_p2) target bundleno = 3 (0x3), region = 67 }
 0x1ac   :  { %1657 = vsyncpa [#allocation4], 1 }
 0x1ad   :  { %1659 = vsyncpa [#allocation4 + $0x1], 1 }

</bundles_post_ra>
